<compile_context>
chip_gen: v7x
topology: tpu7x:2x2x1
jax: 0.10.0
libtpu: 0.0.40
codegen_flags: <defaults>
</compile_context>

<pallas_src>
import jax
import jax.numpy as jnp
from jax import lax
from jax.experimental import pallas as pl
from jax.experimental.pallas import tpu as pltpu


# ------------------------------ fused kernel ------------------------------- #

def fused_conv_bn_relu_kernel(x_ref, w0_ref, b0_ref, w1_ref, b1_ref,
                              o_ref, pad_ref):
    """One image per grid step.

    x_ref   : (1, H*W, Cin)    bf16 NHWC input (H,W collapsed wrapper-side)
    w0_ref  : (Cin, Cout)      bf16 1x1 conv weight with BN scale folded in
    b0_ref  : (1, Cout)        f32 folded bias (conv bias + BN) for stage 0
    w1_ref  : (3, 3, Cout)     f32 depthwise taps with BN scale folded in
    b1_ref  : (1, Cout)        f32 folded bias for stage 1
    o_ref   : (1, H, W, Cout)  f32 NHWC output tile
    pad_ref : (H+2, W, Cout)   f32 VMEM scratch (row-padded stage-0 activation)
    """
    _, H, W, Cout = o_ref.shape

    # ---- stage 0: 1x1 conv (+ folded BN) + ReLU, straight into the scratch.
    # bf16 x bf16 operands -> native MXU passes; f32 accumulation.
    x2d = x_ref[0]                                            # (H*W, Cin) bf16
    y2d = jnp.dot(x2d, w0_ref[...], preferred_element_type=jnp.float32)
    y2d = jnp.maximum(y2d + b0_ref[...], 0.0)
    # Column offset 0 => sublane-aligned, unmasked stores.
    pad_ref[1:H + 1, :, :] = y2d.reshape(H, W, Cout)

    # Zero only the two halo rows.  This must happen every grid step on every
    # core (each TensorCore owns its own scratch under the "parallel" grid);
    # the interior is fully overwritten above so it needs no clearing.
    zero_row = jnp.zeros((W, Cout), jnp.float32)
    pad_ref[0, :, :] = zero_row
    pad_ref[H + 1, :, :] = zero_row

    # ---- stage 1: 3x3 depthwise conv (+ folded BN) + ReLU from the scratch.
    # dh taps: plain leading-dim slices (free address offsets).
    # dw taps: pltpu.roll along W (XLU slot) + boundary masks, so no
    # misaligned sublane reads are materialized.
    p = pad_ref[...]                                          # (H+2, W, Cout)
    col = lax.broadcasted_iota(jnp.int32, (1, W, 1), 1)
    p_wm1 = jnp.where(col > 0, pltpu.roll(p, 1, axis=1), 0.0)          # value at w-1
    p_wp1 = jnp.where(col < W - 1, pltpu.roll(p, W - 1, axis=1), 0.0)  # value at w+1

    # Accumulator initialized with the folded bias -> 9 FMAs, no trailing add.
    acc = jnp.broadcast_to(b1_ref[0, :], (H, W, Cout)).astype(jnp.float32)
    for i in range(3):                                        # static, fully unrolled
        acc = acc + p_wm1[i:i + H] * w1_ref[i, 0, :]
        acc = acc + p[i:i + H] * w1_ref[i, 1, :]
        acc = acc + p_wp1[i:i + H] * w1_ref[i, 2, :]
    o_ref[0] = jnp.maximum(acc, 0.0).astype(o_ref.dtype)


# -------------------------------- wrapper ----------------------------------- #

def _vmem_limit_bytes():
    """Per-generation VMEM budget (leave headroom for compiler scratch)."""
    try:
        cap = pltpu.get_tpu_info().vmem_capacity_bytes
    except Exception:
        cap = 128 * 1024 * 1024
    # ~75% of physical VMEM, capped at 100 MiB: ~96 MiB on v5e/v6e, ~48 MiB on v7x.
    return int(min(cap * 3 // 4, 100 * 1024 * 1024))


def fused_conv_bn_relu(x_nhwc, w0, bias0, w1, bias1, *, out_dtype=jnp.float32):
    """NHWC-native fused forward.  Use this entry point when composing layers
    so activations stay NHWC (no NCHW<->NHWC transposes)."""
    N, H, W, Cin = x_nhwc.shape
    Cout = w0.shape[1]
    # Contiguous metadata-only reshape; keeps the bf16 input 2-D inside the kernel.
    x_flat = x_nhwc.reshape(N, H * W, Cin)
    return pl.pallas_call(
        fused_conv_bn_relu_kernel,
        out_shape=jax.ShapeDtypeStruct((N, H, W, Cout), out_dtype),
        grid_spec=pltpu.PrefetchScalarGridSpec(
            num_scalar_prefetch=0,
            grid=(N,),
            in_specs=[
                pl.BlockSpec((1, H * W, Cin), lambda n: (n, 0, 0)),
                pl.BlockSpec((Cin, Cout), lambda n: (0, 0)),
                pl.BlockSpec((1, Cout), lambda n: (0, 0)),
                pl.BlockSpec((3, 3, Cout), lambda n: (0, 0, 0)),
                pl.BlockSpec((1, Cout), lambda n: (0, 0)),
            ],
            out_specs=pl.BlockSpec((1, H, W, Cout), lambda n: (n, 0, 0, 0)),
            scratch_shapes=[pltpu.VMEM((H + 2, W, Cout), jnp.float32)],
        ),
        compiler_params=pltpu.CompilerParams(
            dimension_semantics=("parallel",),
            vmem_limit_bytes=_vmem_limit_bytes(),
        ),
    )(x_flat, w0, bias0, w1, bias1)


def conv2d_forward(x_nchw, params):
    """Full module forward with the PyTorch NCHW contract (output NCHW, f32).

    The bf16 cast is fused into the NCHW->NHWC transpose (a single XLA op), so
    presenting bf16 MXU operands adds no extra HBM pass over the transpose the
    NCHW contract already forces.
    """
    x_nhwc = jnp.transpose(x_nchw, (0, 2, 3, 1)).astype(jnp.bfloat16)
    z_nhwc = fused_conv_bn_relu(x_nhwc, params["w0"], params["bias0"],
                                params["w1"], params["bias1"])
    return jnp.transpose(z_nhwc, (0, 3, 1, 2))


# ----------------------------- parameter setup ------------------------------ #

def make_params(key, in_embedding, out_embedding):
    """Returns (kernel params with BN folded into weights/bias, raw params)."""
    eps = 1e-5
    ks = jax.random.split(key, 12)

    # net0: 1x1 conv (torch weight (Cout, Cin, 1, 1) -> matmul weight (Cin, Cout))
    w0 = 0.05 * jax.random.normal(ks[0], (in_embedding, out_embedding), jnp.float32)
    b0 = 0.05 * jax.random.normal(ks[1], (out_embedding,), jnp.float32)
    gamma0 = 1.0 + 0.1 * jax.random.normal(ks[2], (out_embedding,), jnp.float32)
    beta0 = 0.1 * jax.random.normal(ks[3], (out_embedding,), jnp.float32)
    mean0 = 0.1 * jax.random.normal(ks[4], (out_embedding,), jnp.float32)
    var0 = 0.5 + jax.random.uniform(ks[5], (out_embedding,), jnp.float32)

    # net1: depthwise 3x3 conv (torch weight (C, 1, 3, 3) -> (3, 3, C))
    w1 = 0.05 * jax.random.normal(ks[6], (3, 3, out_embedding), jnp.float32)
    b1 = 0.05 * jax.random.normal(ks[7], (out_embedding,), jnp.float32)
    gamma1 = 1.0 + 0.1 * jax.random.normal(ks[8], (out_embedding,), jnp.float32)
    beta1 = 0.1 * jax.random.normal(ks[9], (out_embedding,), jnp.float32)
    mean1 = 0.1 * jax.random.normal(ks[10], (out_embedding,), jnp.float32)
    var1 = 0.5 + jax.random.uniform(ks[11], (out_embedding,), jnp.float32)

    # Fold eval-mode BN (+ conv bias) into the conv weights and a single bias.
    s0 = gamma0 / jnp.sqrt(var0 + eps)
    s1 = gamma1 / jnp.sqrt(var1 + eps)
    kernel_params = {
        "w0": (w0 * s0[None, :]).astype(jnp.bfloat16),      # bf16 MXU operand
        "bias0": (beta0 + s0 * (b0 - mean0)).reshape(1, out_embedding),
        "w1": w1 * s1[None, None, :],                       # depthwise stays f32
        "bias1": (beta1 + s1 * (b1 - mean1)).reshape(1, out_embedding),
    }
    raw = dict(w0=w0, b0=b0, gamma0=gamma0, beta0=beta0, mean0=mean0, var0=var0,
               w1=w1, b1=b1, gamma1=gamma1, beta1=beta1, mean1=mean1, var1=var1,
               eps=eps)
    return kernel_params, raw


# -------------------------------- reference --------------------------------- #

def reference(x_nchw, raw):
    """Pure-JAX f32 reference using the *unfolded* conv+BN+ReLU math."""
    eps = raw["eps"]
    x = jnp.transpose(x_nchw, (0, 2, 3, 1))                  # NHWC
    y = jnp.einsum("nhwc,cd->nhwd", x, raw["w0"]) + raw["b0"]
    y = (y - raw["mean0"]) / jnp.sqrt(raw["var0"] + eps) * raw["gamma0"] + raw["beta0"]
    y = jnp.maximum(y, 0.0)
    w1 = raw["w1"][:, :, None, :]                             # (3,3,1,C) HWIO depthwise
    C = w1.shape[-1]
    z = lax.conv_general_dilated(
        y, w1, window_strides=(1, 1), padding="SAME",
        dimension_numbers=("NHWC", "HWIO", "NHWC"), feature_group_count=C) + raw["b1"]
    z = (z - raw["mean1"]) / jnp.sqrt(raw["var1"] + eps) * raw["gamma1"] + raw["beta1"]
    z = jnp.maximum(z, 0.0)
    return jnp.transpose(z, (0, 3, 1, 2))                     # back to NCHW


# ---------------------------------- main ------------------------------------ #

if __name__ == "__main__":
    in_embedding, out_embedding = 128, 128   # scaled down from the 768 default
    N, H, W = 2, 8, 8

    key = jax.random.PRNGKey(0)
    kx, kp = jax.random.split(key)
    x = jax.random.normal(kx, (N, in_embedding, H, W), jnp.float32)
    params, raw = make_params(kp, in_embedding, out_embedding)

    fwd = jax.jit(conv2d_forward)
    out = jax.block_until_ready(fwd(x, params))
    ref = reference(x, raw)

    assert out.shape == (N, out_embedding, H, W), out.shape
    # bf16 MXU operands -> slightly looser tolerance vs the f32 reference.
    assert bool(jnp.allclose(out, ref, atol=2e-2, rtol=2e-2)), "mismatch vs reference"
    print("KERNEL_OK")
</pallas_src>

<mosaic_0001>
module attributes {stable_mosaic.version = 11 : i64} {
  func.func @fused_conv_bn_relu_kernel(%arg0: i32, %arg1: memref<1x64x128xbf16, #tpu.memory_space<vmem>>, %arg2: memref<128x128xbf16, #tpu.memory_space<vmem>>, %arg3: memref<1x128xf32, #tpu.memory_space<vmem>>, %arg4: memref<3x3x128xf32, #tpu.memory_space<vmem>>, %arg5: memref<1x128xf32, #tpu.memory_space<vmem>>, %arg6: memref<1x8x8x128xf32, #tpu.memory_space<vmem>>, %arg7: memref<10x8x128xf32, #tpu.memory_space<vmem>>) attributes {dimension_semantics = [#tpu.dimension_semantics<parallel>], iteration_bounds = array<i64: 2>, scalar_prefetch = 0 : i64, scratch_operands = 1 : i64, tpu.core_type = #tpu.core_type<tc>, window_params = [{transform_indices = @transform_0, window_bounds = array<i64: 1, 64, 128>}, {pipeline_mode = #tpu.pipeline_mode<synchronous>, transform_indices = @transform_1, window_bounds = array<i64: 128, 128>}, {pipeline_mode = #tpu.pipeline_mode<synchronous>, transform_indices = @transform_2, window_bounds = array<i64: 1, 128>}, {pipeline_mode = #tpu.pipeline_mode<synchronous>, transform_indices = @transform_3, window_bounds = array<i64: 3, 3, 128>}, {pipeline_mode = #tpu.pipeline_mode<synchronous>, transform_indices = @transform_4, window_bounds = array<i64: 1, 128>}, {transform_indices = @transform_5, window_bounds = array<i64: 1, 8, 8, 128>}]} {
    %c0 = arith.constant 0 : index
    %c0_0 = arith.constant 0 : index
    %c0_1 = arith.constant 0 : index
    %0 = vector.load %arg1[%c0, %c0_0, %c0_1] : memref<1x64x128xbf16, #tpu.memory_space<vmem>>, vector<1x64x128xbf16>
    %1 = vector.shape_cast %0 : vector<1x64x128xbf16> to vector<64x128xbf16>
    %c0_2 = arith.constant 0 : index
    %c0_3 = arith.constant 0 : index
    %2 = vector.load %arg2[%c0_2, %c0_3] : memref<128x128xbf16, #tpu.memory_space<vmem>>, vector<128x128xbf16>
    %cst = arith.constant dense<0.000000e+00> : vector<64x128xf32>
    %3 = tpu.matmul %1, %2, %cst {dimension_numbers = #tpu.dot_dimension_numbers<[1], [0], [0], [1], [0, 0, 1, 1], [], []>} : vector<64x128xbf16>, vector<128x128xbf16>, vector<64x128xf32> -> vector<64x128xf32>
    %c0_4 = arith.constant 0 : index
    %c0_5 = arith.constant 0 : index
    %4 = vector.load %arg3[%c0_4, %c0_5] : memref<1x128xf32, #tpu.memory_space<vmem>>, vector<1x128xf32>
    %5 = vector.broadcast %4 : vector<1x128xf32> to vector<64x128xf32>
    %6 = arith.addf %3, %5 : vector<64x128xf32>
    %cst_6 = arith.constant 0.000000e+00 : f32
    %7 = vector.broadcast %cst_6 : f32 to vector<64x128xf32>
    %8 = arith.maximumf %6, %7 : vector<64x128xf32>
    %9 = vector.shape_cast %8 : vector<64x128xf32> to vector<8x8x128xf32>
    %c1 = arith.constant 1 : index
    %c0_7 = arith.constant 0 : index
    %c0_8 = arith.constant 0 : index
    %10 = vector.load %arg7[%c1, %c0_7, %c0_8] : memref<10x8x128xf32, #tpu.memory_space<vmem>>, vector<8x8x128xf32>
    tpu.vector_store %arg7[%c1, %c0_7, %c0_8], %9 {strides = array<i32>} : memref<10x8x128xf32, #tpu.memory_space<vmem>>, vector<8x8x128xf32>,
    %cst_9 = arith.constant 0.000000e+00 : f32
    %11 = vector.broadcast %cst_9 : f32 to vector<8x128xf32>
    %c0_10 = arith.constant 0 : index
    %c0_11 = arith.constant 0 : index
    %c0_12 = arith.constant 0 : index
    %12 = vector.load %arg7[%c0_10, %c0_11, %c0_12] : memref<10x8x128xf32, #tpu.memory_space<vmem>>, vector<1x8x128xf32>
    %13 = vector.shape_cast %12 : vector<1x8x128xf32> to vector<8x128xf32>
    %14 = vector.shape_cast %11 : vector<8x128xf32> to vector<1x8x128xf32>
    tpu.vector_store %arg7[%c0_10, %c0_11, %c0_12], %14 {strides = array<i32>} : memref<10x8x128xf32, #tpu.memory_space<vmem>>, vector<1x8x128xf32>,
    %c9 = arith.constant 9 : index
    %c0_13 = arith.constant 0 : index
    %c0_14 = arith.constant 0 : index
    %15 = vector.load %arg7[%c9, %c0_13, %c0_14] : memref<10x8x128xf32, #tpu.memory_space<vmem>>, vector<1x8x128xf32>
    %16 = vector.shape_cast %15 : vector<1x8x128xf32> to vector<8x128xf32>
    %17 = vector.shape_cast %11 : vector<8x128xf32> to vector<1x8x128xf32>
    tpu.vector_store %arg7[%c9, %c0_13, %c0_14], %17 {strides = array<i32>} : memref<10x8x128xf32, #tpu.memory_space<vmem>>, vector<1x8x128xf32>,
    %c0_15 = arith.constant 0 : index
    %c0_16 = arith.constant 0 : index
    %c0_17 = arith.constant 0 : index
    %18 = vector.load %arg7[%c0_15, %c0_16, %c0_17] : memref<10x8x128xf32, #tpu.memory_space<vmem>>, vector<10x8x128xf32>
    %19 = tpu.iota {dimensions = array<i32: 1>} : vector<1x8x1xi32>
    %c0_i32 = arith.constant 0 : i32
    %20 = vector.broadcast %c0_i32 : i32 to vector<1x8x1xi32>
    %21 = arith.cmpi sgt, %19, %20 : vector<1x8x1xi32>
    %c1_i32 = arith.constant 1 : i32
    %22 = tpu.dynamic_rotate %18 by %c1_i32 dim 1 : vector<10x8x128xf32>, i32 -> vector<10x8x128xf32>
    %cst_18 = arith.constant 0.000000e+00 : f32
    %23 = vector.shape_cast %21 : vector<1x8x1xi1> to vector<1x8x1xi1>
    %24 = vector.broadcast %23 : vector<1x8x1xi1> to vector<10x8x128xi1>
    %25 = vector.broadcast %cst_18 : f32 to vector<10x8x128xf32>
    %26 = arith.select %24, %22, %25 : vector<10x8x128xi1>, vector<10x8x128xf32>
    %c7_i32 = arith.constant 7 : i32
    %27 = vector.broadcast %c7_i32 : i32 to vector<1x8x1xi32>
    %28 = arith.cmpi slt, %19, %27 : vector<1x8x1xi32>
    %c7_i32_19 = arith.constant 7 : i32
    %29 = tpu.dynamic_rotate %18 by %c7_i32_19 dim 1 : vector<10x8x128xf32>, i32 -> vector<10x8x128xf32>
    %cst_20 = arith.constant 0.000000e+00 : f32
    %30 = vector.shape_cast %28 : vector<1x8x1xi1> to vector<1x8x1xi1>
    %31 = vector.broadcast %30 : vector<1x8x1xi1> to vector<10x8x128xi1>
    %32 = vector.broadcast %cst_20 : f32 to vector<10x8x128xf32>
    %33 = arith.select %31, %29, %32 : vector<10x8x128xi1>, vector<10x8x128xf32>
    %c0_21 = arith.constant 0 : index
    %c0_22 = arith.constant 0 : index
    %34 = vector.load %arg5[%c0_21, %c0_22] : memref<1x128xf32, #tpu.memory_space<vmem>>, vector<1x128xf32>
    %35 = vector.shape_cast %34 : vector<1x128xf32> to vector<128xf32>
    %36 = vector.shape_cast %35 : vector<128xf32> to vector<1x1x128xf32>
    %37 = vector.broadcast %36 : vector<1x1x128xf32> to vector<8x8x128xf32>
    %38 = vector.extract_strided_slice %26 {offsets = [0, 0, 0], sizes = [8, 8, 128], strides = [1, 1, 1]} : vector<10x8x128xf32> to vector<8x8x128xf32>
    %c0_23 = arith.constant 0 : index
    %c0_24 = arith.constant 0 : index
    %c0_25 = arith.constant 0 : index
    %39 = vector.load %arg4[%c0_23, %c0_24, %c0_25] : memref<3x3x128xf32, #tpu.memory_space<vmem>>, vector<1x1x128xf32>
    %40 = vector.shape_cast %39 : vector<1x1x128xf32> to vector<128xf32>
    %41 = vector.shape_cast %40 : vector<128xf32> to vector<1x1x128xf32>
    %42 = vector.broadcast %41 : vector<1x1x128xf32> to vector<8x8x128xf32>
    %43 = arith.mulf %38, %42 : vector<8x8x128xf32>
    %44 = arith.addf %37, %43 : vector<8x8x128xf32>
    %45 = vector.extract_strided_slice %18 {offsets = [0, 0, 0], sizes = [8, 8, 128], strides = [1, 1, 1]} : vector<10x8x128xf32> to vector<8x8x128xf32>
    %c0_26 = arith.constant 0 : index
    %c1_27 = arith.constant 1 : index
    %c0_28 = arith.constant 0 : index
    %46 = vector.load %arg4[%c0_26, %c1_27, %c0_28] : memref<3x3x128xf32, #tpu.memory_space<vmem>>, vector<1x1x128xf32>
    %47 = vector.shape_cast %46 : vector<1x1x128xf32> to vector<128xf32>
    %48 = vector.shape_cast %47 : vector<128xf32> to vector<1x1x128xf32>
    %49 = vector.broadcast %48 : vector<1x1x128xf32> to vector<8x8x128xf32>
    %50 = arith.mulf %45, %49 : vector<8x8x128xf32>
    %51 = arith.addf %44, %50 : vector<8x8x128xf32>
    %52 = vector.extract_strided_slice %33 {offsets = [0, 0, 0], sizes = [8, 8, 128], strides = [1, 1, 1]} : vector<10x8x128xf32> to vector<8x8x128xf32>
    %c0_29 = arith.constant 0 : index
    %c2 = arith.constant 2 : index
    %c0_30 = arith.constant 0 : index
    %53 = vector.load %arg4[%c0_29, %c2, %c0_30] : memref<3x3x128xf32, #tpu.memory_space<vmem>>, vector<1x1x128xf32>
    %54 = vector.shape_cast %53 : vector<1x1x128xf32> to vector<128xf32>
    %55 = vector.shape_cast %54 : vector<128xf32> to vector<1x1x128xf32>
    %56 = vector.broadcast %55 : vector<1x1x128xf32> to vector<8x8x128xf32>
    %57 = arith.mulf %52, %56 : vector<8x8x128xf32>
    %58 = arith.addf %51, %57 : vector<8x8x128xf32>
    %59 = vector.extract_strided_slice %26 {offsets = [1, 0, 0], sizes = [8, 8, 128], strides = [1, 1, 1]} : vector<10x8x128xf32> to vector<8x8x128xf32>
    %c1_31 = arith.constant 1 : index
    %c0_32 = arith.constant 0 : index
    %c0_33 = arith.constant 0 : index
    %60 = vector.load %arg4[%c1_31, %c0_32, %c0_33] : memref<3x3x128xf32, #tpu.memory_space<vmem>>, vector<1x1x128xf32>
    %61 = vector.shape_cast %60 : vector<1x1x128xf32> to vector<128xf32>
    %62 = vector.shape_cast %61 : vector<128xf32> to vector<1x1x128xf32>
    %63 = vector.broadcast %62 : vector<1x1x128xf32> to vector<8x8x128xf32>
    %64 = arith.mulf %59, %63 : vector<8x8x128xf32>
    %65 = arith.addf %58, %64 : vector<8x8x128xf32>
    %66 = vector.extract_strided_slice %18 {offsets = [1, 0, 0], sizes = [8, 8, 128], strides = [1, 1, 1]} : vector<10x8x128xf32> to vector<8x8x128xf32>
    %c1_34 = arith.constant 1 : index
    %c1_35 = arith.constant 1 : index
    %c0_36 = arith.constant 0 : index
    %67 = vector.load %arg4[%c1_34, %c1_35, %c0_36] : memref<3x3x128xf32, #tpu.memory_space<vmem>>, vector<1x1x128xf32>
    %68 = vector.shape_cast %67 : vector<1x1x128xf32> to vector<128xf32>
    %69 = vector.shape_cast %68 : vector<128xf32> to vector<1x1x128xf32>
    %70 = vector.broadcast %69 : vector<1x1x128xf32> to vector<8x8x128xf32>
    %71 = arith.mulf %66, %70 : vector<8x8x128xf32>
    %72 = arith.addf %65, %71 : vector<8x8x128xf32>
    %73 = vector.extract_strided_slice %33 {offsets = [1, 0, 0], sizes = [8, 8, 128], strides = [1, 1, 1]} : vector<10x8x128xf32> to vector<8x8x128xf32>
    %c1_37 = arith.constant 1 : index
    %c2_38 = arith.constant 2 : index
    %c0_39 = arith.constant 0 : index
    %74 = vector.load %arg4[%c1_37, %c2_38, %c0_39] : memref<3x3x128xf32, #tpu.memory_space<vmem>>, vector<1x1x128xf32>
    %75 = vector.shape_cast %74 : vector<1x1x128xf32> to vector<128xf32>
    %76 = vector.shape_cast %75 : vector<128xf32> to vector<1x1x128xf32>
    %77 = vector.broadcast %76 : vector<1x1x128xf32> to vector<8x8x128xf32>
    %78 = arith.mulf %73, %77 : vector<8x8x128xf32>
    %79 = arith.addf %72, %78 : vector<8x8x128xf32>
    %80 = vector.extract_strided_slice %26 {offsets = [2, 0, 0], sizes = [8, 8, 128], strides = [1, 1, 1]} : vector<10x8x128xf32> to vector<8x8x128xf32>
    %c2_40 = arith.constant 2 : index
    %c0_41 = arith.constant 0 : index
    %c0_42 = arith.constant 0 : index
    %81 = vector.load %arg4[%c2_40, %c0_41, %c0_42] : memref<3x3x128xf32, #tpu.memory_space<vmem>>, vector<1x1x128xf32>
    %82 = vector.shape_cast %81 : vector<1x1x128xf32> to vector<128xf32>
    %83 = vector.shape_cast %82 : vector<128xf32> to vector<1x1x128xf32>
    %84 = vector.broadcast %83 : vector<1x1x128xf32> to vector<8x8x128xf32>
    %85 = arith.mulf %80, %84 : vector<8x8x128xf32>
    %86 = arith.addf %79, %85 : vector<8x8x128xf32>
    %87 = vector.extract_strided_slice %18 {offsets = [2, 0, 0], sizes = [8, 8, 128], strides = [1, 1, 1]} : vector<10x8x128xf32> to vector<8x8x128xf32>
    %c2_43 = arith.constant 2 : index
    %c1_44 = arith.constant 1 : index
    %c0_45 = arith.constant 0 : index
    %88 = vector.load %arg4[%c2_43, %c1_44, %c0_45] : memref<3x3x128xf32, #tpu.memory_space<vmem>>, vector<1x1x128xf32>
    %89 = vector.shape_cast %88 : vector<1x1x128xf32> to vector<128xf32>
    %90 = vector.shape_cast %89 : vector<128xf32> to vector<1x1x128xf32>
    %91 = vector.broadcast %90 : vector<1x1x128xf32> to vector<8x8x128xf32>
    %92 = arith.mulf %87, %91 : vector<8x8x128xf32>
    %93 = arith.addf %86, %92 : vector<8x8x128xf32>
    %94 = vector.extract_strided_slice %33 {offsets = [2, 0, 0], sizes = [8, 8, 128], strides = [1, 1, 1]} : vector<10x8x128xf32> to vector<8x8x128xf32>
    %c2_46 = arith.constant 2 : index
    %c2_47 = arith.constant 2 : index
    %c0_48 = arith.constant 0 : index
    %95 = vector.load %arg4[%c2_46, %c2_47, %c0_48] : memref<3x3x128xf32, #tpu.memory_space<vmem>>, vector<1x1x128xf32>
    %96 = vector.shape_cast %95 : vector<1x1x128xf32> to vector<128xf32>
    %97 = vector.shape_cast %96 : vector<128xf32> to vector<1x1x128xf32>
    %98 = vector.broadcast %97 : vector<1x1x128xf32> to vector<8x8x128xf32>
    %99 = arith.mulf %94, %98 : vector<8x8x128xf32>
    %100 = arith.addf %93, %99 : vector<8x8x128xf32>
    %cst_49 = arith.constant 0.000000e+00 : f32
    %101 = vector.broadcast %cst_49 : f32 to vector<8x8x128xf32>
    %102 = arith.maximumf %100, %101 : vector<8x8x128xf32>
    %c0_50 = arith.constant 0 : index
    %c0_51 = arith.constant 0 : index
    %c0_52 = arith.constant 0 : index
    %c0_53 = arith.constant 0 : index
    %103 = vector.load %arg6[%c0_50, %c0_51, %c0_52, %c0_53] : memref<1x8x8x128xf32, #tpu.memory_space<vmem>>, vector<1x8x8x128xf32>
    %104 = vector.shape_cast %103 : vector<1x8x8x128xf32> to vector<8x8x128xf32>
    %105 = vector.shape_cast %102 : vector<8x8x128xf32> to vector<1x8x8x128xf32>
    tpu.vector_store %arg6[%c0_50, %c0_51, %c0_52, %c0_53], %105 {strides = array<i32>} : memref<1x8x8x128xf32, #tpu.memory_space<vmem>>, vector<1x8x8x128xf32>,
    return
  }
  func.func @transform_0(%arg0: i32) -> (i32, i32, i32) {
    %c0_i32 = arith.constant 0 : i32
    %c0_i32_0 = arith.constant 0 : i32
    %c0_i32_1 = arith.constant 0 : i32
    return %arg0, %c0_i32, %c0_i32_0 : i32, i32, i32
  }
  func.func @transform_1(%arg0: i32) -> (i32, i32) {
    %c0_i32 = arith.constant 0 : i32
    %c0_i32_0 = arith.constant 0 : i32
    %c0_i32_1 = arith.constant 0 : i32
    return %c0_i32, %c0_i32_0 : i32, i32
  }
  func.func @transform_2(%arg0: i32) -> (i32, i32) {
    %c0_i32 = arith.constant 0 : i32
    %c0_i32_0 = arith.constant 0 : i32
    %c0_i32_1 = arith.constant 0 : i32
    return %c0_i32, %c0_i32_0 : i32, i32
  }
  func.func @transform_3(%arg0: i32) -> (i32, i32, i32) {
    %c0_i32 = arith.constant 0 : i32
    %c0_i32_0 = arith.constant 0 : i32
    %c0_i32_1 = arith.constant 0 : i32
    %c0_i32_2 = arith.constant 0 : i32
    return %c0_i32, %c0_i32_0, %c0_i32_1 : i32, i32, i32
  }
  func.func @transform_4(%arg0: i32) -> (i32, i32) {
    %c0_i32 = arith.constant 0 : i32
    %c0_i32_0 = arith.constant 0 : i32
    %c0_i32_1 = arith.constant 0 : i32
    return %c0_i32, %c0_i32_0 : i32, i32
  }
  func.func @transform_5(%arg0: i32) -> (i32, i32, i32, i32) {
    %c0_i32 = arith.constant 0 : i32
    %c0_i32_0 = arith.constant 0 : i32
    %c0_i32_1 = arith.constant 0 : i32
    %c0_i32_2 = arith.constant 0 : i32
    return %arg0, %c0_i32, %c0_i32_0, %c0_i32_1 : i32, i32, i32, i32
  }
}

</mosaic_0001>

<bundles_post_ra>
// kernel: conv2d_forward.1
= control target key start
LH: loop header
LB: loop body
LE: loop exit
PB: predicated region body
PF: predicated region fallthrough
CT: control target
= control target key end

     0   :  { %10 = vsyncpa [#allocation4], 0  ;;  %s1878_s0 = inlined_call_operand.hbm [shape: bf16[2,64,128], index: 0, kind: input, shape index: {}]   ;;  %s1879_s1 = inlined_call_operand.hbm [shape: bf16[128,128], index: 1, kind: input, shape index: {}]   ;;  %s1880_s2 = inlined_call_operand.hbm [shape: f32[1,128], index: 2, kind: input, shape index: {}]   ;;  %s1881_s3 = inlined_call_operand.hbm [shape: f32[3,3,128], index: 3, kind: input, shape index: {}]   ;;  %s1882_s4 = inlined_call_operand.hbm [shape: f32[1,128], index: 4, kind: input, shape index: {}]   ;;  %s1883_s5 = inlined_call_operand.hbm [shape: f32[2,8,8,128], index: 5, kind: output, shape index: {}]  }
   0x1   :  { %12 = vsyncpa [#allocation4 + $0x1], 0 }
   0x2   :  { %13 = vsyncpa [#allocation7], 0 }
   0x3   :  { %14 = vsyncpa [#allocation10], 0 }
   0x4   :  { %15 = vsyncpa [#allocation5], 0 }
   0x5   :  { %17 = vsyncpa [#allocation5 + $0x1], 0  ;;  %s1345_s18 = smov 0   ;;  %s1347_s19 = smov 0  }
   0x6   :  { %s1349_s20 = smov 0   ;;  %s1351_s21 = smov 0  }
   0x7 LB: > { %s1366_s22 = sadd.s32 4294967295, %s1302_s21   ;;  %s883_s23 = sadd.s32 4294967294, %s1302_s21   ;;  %s1302_s21 = sphi %s1351_s21, %s1909_s21   ;;  %s1298_s20 = sphi %s1349_s20, %s1908_s20   ;;  %s1294_s19 = sphi %s1347_s19, %s1907_s19   ;;  %s1290_s18 = sphi %s1345_s18, %s1906_s18  }
   0x8   : > { %p43_p0 = scmp.ne.s32.totalorder %s1294_s19, %s1290_s18  ;;  %p1884_p1 = scmp.eq.s32.totalorder %s1366_s22, 0 }
   0x9   : > { %p157_p3 = scmp.eq.s32.totalorder %s883_s23, 1  ;;  %p884_p5 = scmp.ge.s32.totalorder %s1302_s21, 1 }
   0xa   : > { %p1375_p4 = por %p1884_p1, %p43_p0  ;;  %p164_p7 = scmp.lt.s32.totalorder %s1302_s21, 3 }
   0xb   : > { %p1380_p6 = por %p157_p3, %p43_p0  ;;  %s1304_s27 = smov [#allocation6]  }
   0xc   : > { %s1888_s24 = scalar_select %p1375_p4, 1, 0 }
   0xd   : > { %s1889_s25 = scalar_select %p1380_p6, 1, 0 }
   0xe   : > { %p1385_p8 = pnand %p884_p5, %p164_p7  ;;  %s176_s28 = sshll.u32 %s1304_s27, 4  ;;  %s1389_s28 = int_to_ptr.vmem [resolvable:$true] %s176_s28 }
   0xf   : > { %s1305_s30 = smov [#allocation9]   ;;  %s1306_s7 = smov [#allocation8]  }
  0x10   : > { %s1890_s26 = scalar_select %p1385_p8, 1, 0 }
  0x11   : > { %p1002_p9 = pneg %p1385_p8  ;;  %s200_s6 = sshll.u32 %s1305_s30, 4  ;;  %s1400_s6 = int_to_ptr.vmem [resolvable:$true] %s200_s6 }
  0x12   : > { %s1402_s8 = sshll.u32 %s1306_s7, 4  ;;  %s1086_s11 = scalar_lea.hbm %s1879_s1, 1024  ;;  %s191_s8 = int_to_ptr.vmem [resolvable:$true] %s1402_s8 }
  0x13   : > { %p1396_p11 = pnand %p1002_p9, %p1884_p1  ;;  %p1087_p12 = scmp.ne.s32.totalorder %s1879_s1, %s1086_s11 }
  0x14   : > { %p1093_p5 = scmp.lt.u32.totalorder %s1086_s11, %s1879_s1 }
  0x15   : > { %p1412_p13 = pneg %p1396_p11 }
  0x17   : > { %p1089_p0 = pnand %p1412_p13, %p1087_p12 }
  0x19   : > { %p1090_p3 = pneg %p1089_p0 }
  0x1b   : > { %p1095_p7 = pnand %p1093_p5, %p1090_p3 }
  0x1d   : > { %1098 = shalt.err (!%p1095_p7)
}
  0x1e   : > { %s1099_s17 = scalar_lea.vmem %s1389_s28, 1024  ;;  %p1107_p2 = scmp.lt.s32.totalorder %s1389_s28, %s1389_s28 }
  0x1f   : > { %p1100_p9 = scmp.ne.s32.totalorder %s1389_s28, %s1099_s17  ;;  %p1108_p6 = scmp.lt.s32.totalorder %s1099_s17, %s1099_s17 }
  0x21   : > { %p1102_p10 = pnand %p1100_p9, %p1412_p13  ;;  %p1109_p12 = por %p1108_p6, %p1107_p2 }
  0x23   : > { %p1103_p1 = pneg %p1102_p10 }
  0x25   : > { %p1110_p0 = pnand %p1109_p12, %p1103_p1 }
  0x27   : > { %1113 = shalt.err (!%p1110_p0)
}
  0x28   : > { %s1307_s23 = smov 64   ;;  %s1308_s27 = smov 4  }
  0x29   : > { %1005 = dma.hbm_to_vmem [thread:$0]  (!%p1396_p11), %s1879_s1, 1024, %s1389_s28, [#allocation7], %s1307_s23, %s1307_s23, %s1308_s27  }
  0x2a   : > { %s1114_s11 = scalar_lea.hbm %s1881_s3, 192 }
  0x2b   : > { %p1115_p1 = scmp.ne.s32.totalorder %s1881_s3, %s1114_s11  ;;  %p1121_p10 = scmp.lt.u32.totalorder %s1114_s11, %s1881_s3 }
  0x2d   : > { %p1117_p2 = pnand %p1115_p1, %p1412_p13 }
  0x2f   : > { %p1118_p6 = pneg %p1117_p2 }
  0x31   : > { %p1123_p3 = pnand %p1121_p10, %p1118_p6 }
  0x33   : > { %1126 = shalt.err (!%p1123_p3)
}
  0x34   : > { %s1127_s28 = scalar_lea.vmem %s1400_s6, 192  ;;  %p1135_p12 = scmp.lt.s32.totalorder %s1400_s6, %s1400_s6 }
  0x35   : > { %p1128_p5 = scmp.ne.s32.totalorder %s1400_s6, %s1127_s28  ;;  %p1136_p0 = scmp.lt.s32.totalorder %s1127_s28, %s1127_s28 }
  0x37   : > { %p1130_p7 = pnand %p1128_p5, %p1412_p13  ;;  %p1137_p1 = por %p1136_p0, %p1135_p12 }
  0x39   : > { %p1131_p9 = pneg %p1130_p7 }
  0x3b   : > { %p1138_p2 = pnand %p1137_p1, %p1131_p9 }
  0x3d   : > { %1141 = shalt.err (!%p1138_p2)
}
  0x3e   : > { %1011 = dma.hbm_to_vmem [thread:$0]  (!%p1396_p11), %s1881_s3, 192, %s1400_s6, [#allocation10], %s1307_s23, %s1307_s23, %s1308_s27  }
  0x3f   : > { %s1142_s10 = scalar_lea.hbm %s1880_s2, 16 }
  0x40   : > { %p1143_p6 = scmp.ne.s32.totalorder %s1880_s2, %s1142_s10  ;;  %p1149_p5 = scmp.lt.u32.totalorder %s1142_s10, %s1880_s2 }
  0x42   : > { %p1145_p10 = pnand %p1143_p6, %p1412_p13 }
  0x44   : > { %p1146_p3 = pneg %p1145_p10 }
  0x46   : > { %p1151_p7 = pnand %p1149_p5, %p1146_p3 }
  0x48   : > { %1154 = shalt.err (!%p1151_p7)
}
  0x49   : > { %s1155_s16 = scalar_lea.vmem %s191_s8, 16  ;;  %s1162_s6 = scalar_lea.vmem %s191_s8, 32 }
  0x4a   : > { %p1156_p9 = scmp.ne.s32.totalorder %s191_s8, %s1155_s16  ;;  %p1163_p1 = scmp.lt.s32.totalorder %s191_s8, %s191_s8 }
  0x4b   : > { %p1164_p2 = scmp.lt.s32.totalorder %s1162_s6, %s1155_s16 }
  0x4c   : > { %p1158_p12 = pnand %p1156_p9, %p1412_p13 }
  0x4d   : > { %p1165_p4 = por %p1164_p2, %p1163_p1 }
  0x4e   : > { %p1159_p0 = pneg %p1158_p12 }
  0x50   : > { %p1166_p8 = pnand %p1165_p4, %p1159_p0 }
  0x52   : > { %1169 = shalt.err (!%p1166_p8)
}
  0x53   : > { %1008 = dma.hbm_to_vmem [thread:$0]  (!%p1396_p11), %s1880_s2, 16, %s191_s8, [#allocation7]  }
  0x54   : > { %s1309_s30 = smov [#allocation11]   ;;  %s1170_s11 = scalar_lea.hbm %s1882_s4, 16 }
  0x55   : > { %s214_s7 = sshll.u32 %s1309_s30, 4  ;;  %p1171_p6 = scmp.ne.s32.totalorder %s1882_s4, %s1170_s11  ;;  %s215_s7 = int_to_ptr.vmem [resolvable:$true] %s214_s7 }
  0x56   : > { %p1177_p10 = scmp.lt.u32.totalorder %s1170_s11, %s1882_s4 }
  0x57   : > { %p1173_p4 = pnand %p1171_p6, %p1412_p13 }
  0x59   : > { %p1174_p8 = pneg %p1173_p4 }
  0x5b   : > { %p1179_p3 = pnand %p1177_p10, %p1174_p8 }
  0x5d   : > { %1182 = shalt.err (!%p1179_p3)
}
  0x5e   : > { %s1183_s8 = scalar_lea.vmem %s215_s7, 16  ;;  %s1190_s6 = scalar_lea.vmem %s215_s7, 32 }
  0x5f   : > { %p1184_p5 = scmp.ne.s32.totalorder %s215_s7, %s1183_s8  ;;  %p1191_p12 = scmp.lt.s32.totalorder %s215_s7, %s215_s7 }
  0x60   : > { %p1192_p0 = scmp.lt.s32.totalorder %s1190_s6, %s1183_s8 }
  0x61   : > { %p1186_p7 = pnand %p1184_p5, %p1412_p13 }
  0x62   : > { %p1193_p1 = por %p1192_p0, %p1191_p12 }
  0x63   : > { %p1187_p9 = pneg %p1186_p7 }
  0x65   : > { %p1194_p2 = pnand %p1193_p1, %p1187_p9 }
  0x67   : > { %1197 = shalt.err (!%p1194_p2)
}
  0x68   : > { %1014 = dma.hbm_to_vmem [thread:$0]  (!%p1396_p11), %s1882_s4, 16, %s215_s7, [#allocation10]  }
  0x69   : > { %s1500_s14 = sadd.s32 1, %s1302_s21   ;;  %s30_s30 = sadd.s32 1, %s1298_s20 }
  0x6a   : > { %s27_s29 = ssub.s32 %s1302_s21, %s1500_s14  ;;  %p37_p13 = scmp.ne.s32.totalorder %s1298_s20, %s1294_s19 }
  0x6b   : > { %p28_p6 = scmp.eq.s32.totalorder %s27_s29, 0  ;;  %p38_p4 = scmp.eq.s32.totalorder %s1302_s21, 0 }
  0x6c   : > { %p1893_p8 = scmp.eq.s32.totalorder %s1366_s22, 1  ;;  %p1027_p3 = scmp.lt.s32.totalorder %s1302_s21, 2 }
  0x6d   : > { %s1516_s10 = scalar_select %p28_p6, %s1298_s20, %s30_s30  }
  0x6e   : > { %p1510_p10 = por %p1893_p8, %p37_p13  ;;  %p39_p5 = por %p38_p4, %p37_p13 }
  0x6f   : > { %s225_s11 = sand.u32 1, %s1298_s20   ;;  %s928_s7 = sshll.u32 %s1302_s21, 9 }
  0x70   : > { %s890_s12 = sshll.u32 %s225_s11, 5  ;;  %s1523_s16 = scalar_lea.hbm %s1878_s0, %s928_s7 }
  0x71   : > { %s229_s8 = scalar_lea.vmem [#allocation3], %s890_s12  ;;  %p1527_p11 = pnand %p1027_p3, %p39_p5 }
  0x72   : > { %s236_s6 = sshll.u32 %s229_s8, 4  ;;  %s1531_s17 = scalar_lea.sflag [#allocation4], %s225_s11  ;;  %s1525_s6 = int_to_ptr.vmem [resolvable:$true] %s236_s6 }
  0x73   : > { %s1198_s30 = scalar_lea.hbm %s1523_s16, 512  ;;  %p1200_p9 = pneg %p1527_p11 }
  0x74   : > { %p1199_p7 = scmp.ne.s32.totalorder %s1523_s16, %s1198_s30  ;;  %s1203_s7 = scalar_lea.hbm %s1878_s0, 1024 }
  0x75   : > { %p1204_p1 = scmp.lt.u32.totalorder %s1523_s16, %s1878_s0  ;;  %p1205_p2 = scmp.lt.u32.totalorder %s1203_s7, %s1198_s30 }
  0x76   : > { %p1201_p12 = pnand %p1200_p9, %p1199_p7  ;;  %p1207_p6 = scmp.lt.u32.totalorder %s1198_s30, %s1523_s16 }
  0x77   : > { %p1206_p13 = por %p1205_p2, %p1204_p1 }
  0x78   : > { %p1202_p0 = pneg %p1201_p12 }
  0x79   : > { %p1208_p4 = por %p1207_p6, %p1206_p13 }
  0x7b   : > { %p1209_p8 = pnand %p1208_p4, %p1202_p0 }
  0x7d   : > { %1212 = shalt.err (!%p1209_p8)
}
  0x7e   : > { %s1213_s11 = scalar_lea.vmem %s1525_s6, 512  ;;  %s1310_s8 = smov [#allocation3]  }
  0x7f   : > { %p1214_p3 = scmp.ne.s32.totalorder %s1525_s6, %s1213_s11  ;;  %s1218_s29 = sshll.u32 %s1310_s8, 4  ;;  %s1219_s29 = int_to_ptr.vmem [resolvable:$false] %s1218_s29 }
  0x80   : > { %s1220_s12 = scalar_lea.vmem %s1219_s29, 1024  ;;  %p1221_p12 = scmp.lt.s32.totalorder %s1525_s6, %s1219_s29 }
  0x81   : > { %p1216_p5 = pnand %p1214_p3, %p1200_p9  ;;  %p1222_p1 = scmp.lt.s32.totalorder %s1220_s12, %s1213_s11 }
  0x83   : > { %p1217_p7 = pneg %p1216_p5  ;;  %p1223_p2 = por %p1222_p1, %p1221_p12 }
  0x85   : > { %p1224_p13 = pnand %p1223_p2, %p1217_p7 }
  0x87   : > { %1227 = shalt.err (!%p1224_p13)
}
  0x88   : > { %1018 = dma.hbm_to_vmem [thread:$0]  (!%p1527_p11), %s1523_s16, 512, %s1525_s6, %s1531_s17, %s1307_s23, %s1307_s23, %s1308_s27  }
  0x89   : > { %p1896_p9 = scmp.ne.s32.totalorder %s1890_s26, 0 }
  0x8b   : > { %248 = sbr.rel (%p1896_p9) target bundleno = 474 (0x1da), region = 40 }
  0x92   : > { %s1565_s30 = sand.u32 1, %s1294_s19   ;;  %p1897_p0 = scmp.ne.s32.totalorder %s1888_s24, 0 }
  0x93   : > { %s894_s7 = sshll.u32 %s1565_s30, 5  ;;  %s251_s13 = scalar_lea.sflag [#allocation4], %s1565_s30 }
  0x94   : > { %s1569_s15 = scalar_lea.vmem [#allocation3], %s894_s7 }
  0x95   : > { %1273 = dma.done.wait (%p1897_p0), %s251_s13, 512  }
  0x96   : > { %1275 = vsyncadd (%p1897_p0), %s251_s13, 4294966784  ;;  %p1898_p11 = scmp.eq.s32.totalorder %s1366_s22, 0 }
  0x98   : > { %1277 = dma.done.wait (%p1898_p11), [#allocation7], 1040   ;;  %p1899_p6 = pmov %p1898_p11 }
  0x9a   : > { %1279 = vsyncadd (%p1899_p6), [#allocation7], 4294966256  ;;  %p1900_p4 = pmov %p1899_p6 }
  0x9c   : > { %1281 = dma.done.wait (%p1900_p4), [#allocation10], 208   ;;  %p1901_p8 = pmov %p1900_p4 }
  0x9d   : > { %v1074_v0 = vld [vmem:[#allocation6] sm:$0xff]   ;;  %v1075_v1 = vld [vmem:[#allocation6 + $0x8] sm:$0xff]   ;;  %v1076_v2 = vld [vmem:[#allocation6 + $0x10] sm:$0xff]   ;;  %v496_v12 = vlaneseq  ;;  %v1311_v14 = vmov 0.0   ;;  %s899_s24 = sshll.u32 %s1565_s30, 6  ;;  %s929_s23 = sshll.u32 %s1366_s22, 10 }
  0x9e   : > { %1283 = vsyncadd (%p1901_p8), [#allocation10], 4294967088  ;;  %942 = vmatprep.subr.bf16.mxu0 %v1074_v0  ;;  %966 = vmatprep.subr.bf16.mxu1 %v1074_v0  ;;  %v1077_v3 = vld [vmem:[#allocation6 + $0x18] sm:$0xff]   ;;  %v1082_v4 = vld [vmem:[%s1569_s15] sm:$0xff]   ;;  %v499_v15 = vrot.slane %v1311_v14, 7  ;;  %v522_v21 = vrot.slane %v1311_v14, 1  ;;  %s1831_s28 = scalar_lea.hbm %s1883_s5, %s929_s23 }
  0x9f   : > { %943 = vmatpush3.bf16.msra.mxu0 %v1074_v0  ;;  %974 = vmatpush3.bf16.msra.mxu1 %v1074_v0  ;;  %v1083_v5 = vld [vmem:[%s1569_s15 + $0x10] sm:$0xff]   ;;  %v1078_v6 = vld [vmem:[#allocation6 + $0x20] sm:$0xff]   ;;  %v1079_v7 = vld [vmem:[#allocation6 + $0x28] sm:$0xff]   ;;  %v1587_v13 = vshrl.u32 %v496_v12, 7  ;;  %s1781_s26 = scalar_lea.vmem [#allocation12], %s899_s24  ;;  %s759_s17 = scalar_lea.sflag [#allocation5], %s1565_s30 }
  0xa0   : > { %944 = vmatprep.subr.bf16.mxu0 %v1075_v1  ;;  %967 = vmatprep.subr.bf16.mxu1 %v1075_v1  ;;  %v1080_v8 = vld [vmem:[#allocation6 + $0x30] sm:$0xff]   ;;  %v1081_v9 = vld [vmem:[#allocation6 + $0x38] sm:$0xff]   ;;  %v1084_v10 = vld [vmem:[%s1569_s15 + $0x8] sm:$0xff]   ;;  %s772_s27 = sshll.u32 %s1781_s26, 4  ;;  %s1312_s22 = smov [#allocation12]   ;;  %s1833_s27 = int_to_ptr.vmem [resolvable:$true] %s772_s27 }
  0xa1   : > { %958 = vmatprep.mubr.bf16.mxu0 %v1082_v4  ;;  %962 = vmatprep.mubr.bf16.mxu1 %v1083_v5  ;;  %v1085_v11 = vld [vmem:[%s1569_s15 + $0x18] sm:$0xff]   ;;  %vm498_vm0 = vcmp.gt.s32.totalorder %v1587_v13, 0  ;;  %v1590_v16 = vld [vmem:[#allocation9] ss:$0 sm:$0xff]  ;;  %v1595_v19 = vld [vmem:[#allocation11] ss:$0 sm:$0xff] }
  0xa2   : > { %v511_v17 = vsel %vm498_vm0, %v499_v15, 0.0  ;;  %v1597_v20 = vld [vmem:[#allocation9 + $0x1] ss:$0 sm:$0xff]  ;;  %vm521_vm1 = vcmp.lt.s32.totalorder %v1587_v13, 7  ;;  %v900_v22 = vld [vmem:[#allocation8] ss:$0 sm:$0xff] }
  0xa3   : > { %945 = vmatpush3.bf16.msra.mxu0 %v1075_v1  ;;  %975 = vmatpush3.bf16.msra.mxu1 %v1075_v1  ;;  %v556_v18 = vmul.f32 %v1590_v16, %v511_v17  ;;  %v577_v24 = vmul.f32 0.0, %v1597_v20  ;;  %v1602_v25 = vld [vmem:[#allocation9 + $0x2] ss:$0 sm:$0xff]  ;;  %v534_v26 = vsel %vm521_vm1, %v522_v21, 0.0  ;;  %v1609_v45 = vld [vmem:[#allocation9 + $0xa] ss:$0 sm:$0xff] }
  0xa4   : > { %946 = vmatprep.subr.bf16.mxu0 %v1076_v2  ;;  %968 = vmatprep.subr.bf16.mxu1 %v1076_v2  ;;  %v598_v34 = vmul.f32 %v1602_v25, %v534_v26  ;;  %v1611_v46 = vld [vmem:[#allocation9 + $0x8] ss:$0 sm:$0xff]  ;;  %v1613_v47 = vld [vmem:[#allocation9 + $0x9] ss:$0 sm:$0xff]  ;;  %v1617_v50 = vmul.f32 %v1609_v45, %v534_v26  ;;  %v1621_v52 = vld [vmem:[#allocation9 + $0x5] ss:$0 sm:$0xff] }
  0xa5   : > { %v564_v23 = vadd.f32 %v1595_v19, %v556_v18  ;;  %v1624_v54 = vmul.f32 %v1611_v46, %v511_v17  ;;  %v1627_v55 = vmul.f32 0.0, %v1613_v47  ;;  %v1632_v61 = vld [vmem:[#allocation9 + $0x4] ss:$0 sm:$0xff]  ;;  %v1634_v62 = vld [vmem:[#allocation9 + $0x6] ss:$0 sm:$0xff]  ;;  %s1228_s11 = scalar_lea.vmem %s1833_s27, 1024 }
  0xa6   : > { %p1229_p3 = scmp.ne.s32.totalorder %s1833_s27, %s1228_s11  ;;  %s1232_s8 = sshll.u32 %s1312_s22, 4  ;;  %s1233_s8 = int_to_ptr.vmem [resolvable:$false] %s1232_s8 }
  0xa7   : > { %947 = vmatpush3.bf16.msra.mxu0 %v1076_v2  ;;  %976 = vmatpush3.bf16.msra.mxu1 %v1076_v2  ;;  %v585_v33 = vadd.f32 %v577_v24, %v564_v23  ;;  %s1234_s29 = scalar_lea.vmem %s1233_s8, 2048  ;;  %p1235_p12 = scmp.lt.s32.totalorder %s1833_s27, %s1233_s8 }
  0xa8   : > { %948 = vmatprep.subr.bf16.mxu0 %v1077_v3  ;;  %969 = vmatprep.subr.bf16.mxu1 %v1077_v3  ;;  %p1230_p5 = pnand %p1229_p3, %p1510_p10  ;;  %p1236_p1 = scmp.lt.s32.totalorder %s1234_s29, %s1228_s11 }
  0xa9   : > { %v606_v49 = vadd.f32 %v598_v34, %v585_v33 }
  0xaa   : > { %p1231_p7 = pneg %p1230_p5  ;;  %p1237_p2 = por %p1236_p1, %p1235_p12 }
  0xab   : > { %949 = vmatpush3.bf16.msra.mxu0 %v1077_v3  ;;  %977 = vmatpush3.bf16.msra.mxu1 %v1077_v3 }
  0xac   : > { %950 = vmatprep.subr.bf16.mxu0 %v1078_v6  ;;  %970 = vmatprep.subr.bf16.mxu1 %v1078_v6  ;;  %p1238_p13 = pnand %p1237_p2, %p1231_p7 }
  0xaf   : > { %951 = vmatpush3.bf16.msra.mxu0 %v1078_v6  ;;  %978 = vmatpush3.bf16.msra.mxu1 %v1078_v6 }
  0xb0   : > { %952 = vmatprep.subr.bf16.mxu0 %v1079_v7  ;;  %971 = vmatprep.subr.bf16.mxu1 %v1079_v7 }
  0xb3   : > { %953 = vmatpush3.bf16.msra.mxu0 %v1079_v7  ;;  %979 = vmatpush3.bf16.msra.mxu1 %v1079_v7 }
  0xb4   : > { %954 = vmatprep.subr.bf16.mxu0 %v1080_v8  ;;  %972 = vmatprep.subr.bf16.mxu1 %v1080_v8 }
  0xb7   : > { %955 = vmatpush3.bf16.msra.mxu0 %v1080_v8  ;;  %980 = vmatpush3.bf16.msra.mxu1 %v1080_v8 }
  0xb8   : > { %956 = vmatprep.subr.bf16.mxu0 %v1081_v9  ;;  %973 = vmatprep.subr.bf16.mxu1 %v1081_v9 }
  0xbb   : > { %957 = vmatpush3.bf16.msra.mxu0 %v1081_v9  ;;  %981 = vmatpush3.bf16.msra.mxu1 %v1081_v9 }
  0xbe   : > { %959 = vmatmul.mubr.bf16.vlgmr.msra.gmra.mrb[0].mxu0 %v1084_v10  ;;  %963 = vmatmul.mubr.bf16.vlgmr.msra.gmra.mrb[0].mxu1 %v1085_v11 }
 0x191   : > { %v960_v27 = vpop.f32.mrb[0].mxu0  ;;  %v964_v28 = vpop.f32.mrb[0].mxu1 }
 0x192   : > { %v444_v29 = vadd.f32 %v960_v27, %v900_v22  ;;  %v460_v30 = vadd.f32 %v964_v28, %v900_v22  ;;  %v435_v31 = vpop.f32.mrb[1].mxu0  ;;  %v451_v32 = vpop.f32.mrb[1].mxu1 }
 0x193   : > { %v961_v35 = vpop.f32.mrb[2].mxu0  ;;  %v965_v36 = vpop.f32.mrb[2].mxu1  ;;  %v436_v39 = vadd.f32 %v900_v22, %v435_v31  ;;  %v452_v42 = vadd.f32 %v900_v22, %v451_v32 }
 0x194   : > { %v468_v37 = vmax.f32 %v444_v29, 0.0  ;;  %v1607_v38 = vmax.f32 %v460_v30, 0.0  ;;  %v438_v40 = vpop.f32.mrb[3].mxu0  ;;  %v454_v41 = vpop.f32.mrb[3].mxu1  ;;  %v447_v58 = vadd.f32 %v961_v35, %v900_v22  ;;  %v463_v59 = vadd.f32 %v965_v36, %v900_v22 }
 0x195   : > { %v466_v53 = vmax.f32 %v436_v39, 0.0  ;;  %v470_v57 = vmax.f32 %v452_v42, 0.0  ;;  %v439_v0 = vadd.f32 %v900_v22, %v438_v40  ;;  %v1640_v1 = vadd.f32 %v900_v22, %v454_v41 }
 0x196   : > { %v502_v43 = vrot.slane %v468_v37, 7  ;;  %v525_v44 = vrot.slane %v468_v37, 1  ;;  %v506_v48 = vrot.slane %v1607_v38, 7  ;;  %v580_v3 = vmul.f32 %v1597_v20, %v468_v37 }
 0x197   : > { %v1645_v4 = vmul.f32 %v1621_v52, %v468_v37  ;;  %v1650_v6 = vmul.f32 %v1613_v47, %v468_v37  ;;  %v529_v7 = vrot.slane %v1607_v38, 1  ;;  %v500_v8 = vrot.slane %v466_v53, 7 }
 0x198   : > { %v514_v51 = vsel %vm498_vm0, %v502_v43, 0.0  ;;  %v537_v60 = vsel %vm521_vm1, %v525_v44, 0.0  ;;  %v1638_v63 = vsel %vm498_vm0, %v506_v48, 0.0  ;;  %v523_v9 = vrot.slane %v466_v53, 1 }
 0x199   : > { %v559_v56 = vmul.f32 %v1590_v16, %v514_v51  ;;  %v563_v5 = vmul.f32 %v1590_v16, %v1638_v63  ;;  %v601_v10 = vmul.f32 %v1602_v25, %v537_v60  ;;  %v1655_v11 = vmul.f32 %v1632_v61, %v514_v51 }
 0x19a   : > { %v1658_v12 = vmul.f32 %v1634_v62, %v537_v60  ;;  %v584_v14 = vmul.f32 %v1597_v20, %v1607_v38  ;;  %v512_v17 = vsel %vm498_vm0, %v500_v8, 0.0  ;;  %v504_v18 = vrot.slane %v470_v57, 7 }
 0x19b   : > { %v567_v2 = vadd.f32 %v1595_v19, %v559_v56  ;;  %v527_v21 = vrot.slane %v470_v57, 1  ;;  %v1665_v22 = vmul.f32 %v1611_v46, %v514_v51  ;;  %v1668_v23 = vmul.f32 %v1609_v45, %v537_v60 }
 0x19c   : > { %v571_v24 = vadd.f32 %v1595_v19, %v563_v5  ;;  %v557_v26 = vmul.f32 %v1590_v16, %v512_v17  ;;  %v1674_v27 = vsel %vm521_vm1, %v529_v7, 0.0  ;;  %v535_v28 = vsel %vm521_vm1, %v523_v9, 0.0 }
 0x19d   : > { %v588_v15 = vadd.f32 %v580_v3, %v567_v2  ;;  %v620_v29 = vmul.f32 %v1632_v61, %v512_v17  ;;  %v516_v30 = vsel %vm498_vm0, %v504_v18, 0.0  ;;  %v1683_v31 = vmul.f32 %v1632_v61, %v1638_v63 }
 0x19e   : > { %v565_v32 = vadd.f32 %v1595_v19, %v557_v26  ;;  %v578_v33 = vmul.f32 %v1597_v20, %v466_v53  ;;  %v561_v34 = vmul.f32 %v1590_v16, %v516_v30  ;;  %v641_v37 = vmul.f32 %v1621_v52, %v466_v53 }
 0x19f   : > { %v609_v35 = vadd.f32 %v601_v10, %v588_v15  ;;  %v628_v36 = vadd.f32 %v620_v29, %v606_v49  ;;  %v1691_v39 = vsel %vm521_vm1, %v527_v21, 0.0  ;;  %v592_v40 = vadd.f32 %v584_v14, %v571_v24 }
 0x1a0   : > { %v586_v41 = vadd.f32 %v578_v33, %v565_v32  ;;  %v599_v42 = vmul.f32 %v1602_v25, %v535_v28  ;;  %v662_v43 = vmul.f32 %v1634_v62, %v535_v28  ;;  %v569_v44 = vadd.f32 %v1595_v19, %v561_v34 }
 0x1a1   : > { %v582_v48 = vmul.f32 %v1597_v20, %v470_v57  ;;  %v1697_v51 = vmax.f32 %v447_v58, 0.0  ;;  %v1699_v56 = vmax.f32 %v463_v59, 0.0  ;;  %v1703_v49 = vmul.f32 %v1602_v25, %v1691_v39 }
 0x1a2   : > { %v624_v53 = vmul.f32 %v1632_v61, %v516_v30  ;;  %v645_v60 = vmul.f32 %v1621_v52, %v470_v57  ;;  %v687_v2 = vmul.f32 %v1611_v46, %v516_v30  ;;  %v649_v3 = vadd.f32 %v641_v37, %v628_v36 }
 0x1a3   : > { %v708_v5 = vmul.f32 %v1613_v47, %v470_v57  ;;  %v503_v7 = vrot.slane %v1697_v51, 7  ;;  %v526_v58 = vrot.slane %v1697_v51, 1  ;;  %v607_v8 = vadd.f32 %v599_v42, %v586_v41 }
 0x1a4   : > { %v729_v59 = vmul.f32 %v1609_v45, %v1691_v39  ;;  %v507_v9 = vrot.slane %v1699_v56, 7  ;;  %v605_v10 = vmul.f32 %v1602_v25, %v1674_v27  ;;  %v590_v14 = vadd.f32 %v582_v48, %v569_v44 }
 0x1a5   : > { %v1718_v15 = vsel %vm498_vm0, %v503_v7, 0.0  ;;  %v530_v57 = vrot.slane %v1699_v56, 1  ;;  %v467_v17 = vmax.f32 %v439_v0, 0.0  ;;  %v1723_v18 = vsel %vm521_vm1, %v526_v58, 0.0 }
 0x1a6   : > { %v560_v21 = vmul.f32 %v1590_v16, %v1718_v15  ;;  %v623_v24 = vmul.f32 %v1632_v61, %v1718_v15  ;;  %v613_v26 = vadd.f32 %v605_v10, %v592_v40  ;;  %v670_v28 = vadd.f32 %v662_v43, %v649_v3 }
 0x1a7   : > { %v581_v29 = vmul.f32 %v1597_v20, %v1697_v51  ;;  %v1733_v30 = vsel %vm498_vm0, %v507_v9, 0.0  ;;  %v1737_v0 = vsel %vm521_vm1, %v530_v57, 0.0  ;;  %v644_v34 = vmul.f32 %v1621_v52, %v1697_v51 }
 0x1a8   : > { %1902 = vst [vmem:[#allocation17_spill] sm:$0xff] %v1737_v0  ;;  %v568_v32 = vadd.f32 %v1595_v19, %v560_v21  ;;  %v631_v33 = vadd.f32 %v623_v24, %v609_v35  ;;  %v627_v36 = vmul.f32 %v1632_v61, %v1733_v30  ;;  %v602_v37 = vmul.f32 %v1602_v25, %v1723_v18 }
 0x1a9   : > { %v665_v40 = vmul.f32 %v1634_v62, %v1723_v18  ;;  %v648_v41 = vmul.f32 %v1621_v52, %v1699_v56  ;;  %v669_v42 = vmul.f32 %v1634_v62, %v1737_v0  ;;  %v501_v48 = vrot.slane %v467_v17, 7 }
 0x1aa   : > { %v589_v43 = vadd.f32 %v581_v29, %v568_v32  ;;  %v652_v35 = vadd.f32 %v644_v34, %v631_v33  ;;  %v635_v44 = vadd.f32 %v627_v36, %v613_v26  ;;  %v524_v3 = vrot.slane %v467_v17, 1 }
 0x1ab   : > { %v579_v7 = vmul.f32 %v1597_v20, %v467_v17  ;;  %v642_v58 = vmul.f32 %v1621_v52, %v467_v17  ;;  %v705_v9 = vmul.f32 %v1613_v47, %v467_v17  ;;  %v513_v24 = vsel %vm498_vm0, %v501_v48, 0.0 }
 0x1ac   : > { %v610_v10 = vadd.f32 %v602_v37, %v589_v43  ;;  %v673_v57 = vadd.f32 %v665_v40, %v652_v35  ;;  %v656_v21 = vadd.f32 %v648_v41, %v635_v44  ;;  %v536_v0 = vsel %vm521_vm1, %v524_v3, 0.0 }
 0x1ad   : > { %v558_v26 = vmul.f32 %v1590_v16, %v513_v24  ;;  %v621_v29 = vmul.f32 %v1632_v61, %v513_v24  ;;  %v684_v32 = vmul.f32 %v1611_v46, %v513_v24  ;;  %v600_v17 = vmul.f32 %v1602_v25, %v536_v0 }
 0x1ae   : > { %v632_v33 = vadd.f32 %v624_v53, %v610_v10  ;;  %v695_v34 = vadd.f32 %v687_v2, %v673_v57  ;;  %v677_v36 = vadd.f32 %v669_v42, %v656_v21  ;;  %v663_v41 = vmul.f32 %v1634_v62, %v536_v0 }
 0x1af   : > { %v566_v37 = vadd.f32 %v1595_v19, %v558_v26  ;;  %v629_v40 = vadd.f32 %v621_v29, %v607_v8  ;;  %v692_v43 = vadd.f32 %v684_v32, %v670_v28  ;;  %v726_v48 = vmul.f32 %v1609_v45, %v536_v0 }
 0x1b0   : > { %v716_v35 = vadd.f32 %v708_v5, %v695_v34  ;;  %v699_v44 = vadd.f32 %v1624_v54, %v677_v36  ;;  %v471_v3 = vmax.f32 %v1640_v1, 0.0  ;;  %v653_v42 = vadd.f32 %v645_v60, %v632_v33 }
 0x1b1   : > { %v587_v24 = vadd.f32 %v579_v7, %v566_v37  ;;  %v650_v53 = vadd.f32 %v642_v58, %v629_v40  ;;  %v713_v2 = vadd.f32 %v705_v9, %v692_v43  ;;  %v666_v28 = vmul.f32 %v1634_v62, %v1691_v39 }
 0x1b2   : > { %v737_v10 = vadd.f32 %v729_v59, %v716_v35  ;;  %v720_v57 = vadd.f32 %v1627_v55, %v699_v44  ;;  %v505_v21 = vrot.slane %v471_v3, 7  ;;  %v528_v8 = vrot.slane %v471_v3, 1 }
 0x1b3   : > { %v608_v5 = vadd.f32 %v600_v17, %v587_v24  ;;  %v671_v26 = vadd.f32 %v663_v41, %v650_v53  ;;  %v734_v54 = vadd.f32 %v726_v48, %v713_v2  ;;  %v611_v0 = vadd.f32 %v1703_v49, %v590_v14 }
 0x1b4   : > { %v745_v29 = vmax.f32 %v737_v10, 0.0  ;;  %v741_v1 = vadd.f32 %v1617_v50, %v720_v57  ;;  %v517_v7 = vsel %vm498_vm0, %v505_v21, 0.0  ;;  %v686_v39 = vmul.f32 %v1611_v46, %v1718_v15 }
 0x1b5   : > { %v630_v60 = vadd.f32 %v1655_v11, %v608_v5  ;;  %v693_v55 = vadd.f32 %v1665_v22, %v671_v26  ;;  %v742_v59 = vmax.f32 %v734_v54, 0.0  ;;  %v562_v58 = vmul.f32 %v1590_v16, %v517_v7 }
 0x1b6   : > { %753 = vst [vmem:[%s1781_s26 + $0x18] sm:$0xff] %v745_v29  ;;  %v749_v50 = vmax.f32 %v741_v1, 0.0  ;;  %v540_v49 = vsel %vm521_vm1, %v528_v8, 0.0  ;;  %v625_v11 = vmul.f32 %v1632_v61, %v517_v7  ;;  %v583_v15 = vmul.f32 %v1597_v20, %v471_v3 }
 0x1b7   : > { %v651_v22 = vadd.f32 %v1645_v4, %v630_v60  ;;  %v714_v14 = vadd.f32 %v1650_v6, %v693_v55  ;;  %750 = vst [vmem:[%s1781_s26] sm:$0xff] %v742_v59  ;;  %v570_v16 = vadd.f32 %v1595_v19, %v562_v58  ;;  %v646_v32 = vmul.f32 %v1621_v52, %v471_v3 }
 0x1b8   : > { %757 = vst [vmem:[%s1781_s26 + $0x38] sm:$0xff] %v749_v50  ;;  %v633_v9 = vadd.f32 %v625_v11, %v611_v0  ;;  %v674_v33 = vadd.f32 %v666_v28, %v653_v42  ;;  %v688_v34 = vmul.f32 %v1611_v46, %v517_v7  ;;  %v604_v4 = vmul.f32 %v1602_v25, %v540_v49 }
 0x1b9   : > { %v672_v13 = vadd.f32 %v1658_v12, %v651_v22  ;;  %v735_v61 = vadd.f32 %v1668_v23, %v714_v14  ;;  %v591_v36 = vadd.f32 %v583_v15, %v570_v16  ;;  %v667_v19 = vmul.f32 %v1634_v62, %v540_v49 }
 0x1ba   : > { %v654_v6 = vadd.f32 %v646_v32, %v633_v9  ;;  %v696_v17 = vadd.f32 %v688_v34, %v674_v33  ;;  %v709_v20 = vmul.f32 %v1613_v47, %v471_v3  ;;  %v707_v37 = vmul.f32 %v1613_v47, %v1697_v51 }
 0x1bb   : > { %v694_v40 = vadd.f32 %v686_v39, %v672_v13  ;;  %v743_v41 = vmax.f32 %v735_v61, 0.0  ;;  %v612_v43 = vadd.f32 %v604_v4, %v591_v36  ;;  %v689_v12 = vmul.f32 %v1611_v46, %v1638_v63 }
 0x1bc   : > { %v675_v23 = vadd.f32 %v667_v19, %v654_v6  ;;  %v717_v35 = vadd.f32 %v709_v20, %v696_v17  ;;  %v730_v25 = vmul.f32 %v1609_v45, %v540_v49  ;;  %v647_v44 = vmul.f32 %v1621_v52, %v1607_v38 }
 0x1bd   : > { %v728_v48 = vmul.f32 %v1609_v45, %v1723_v18  ;;  %v715_v3 = vadd.f32 %v707_v37, %v694_v40  ;;  %751 = vst [vmem:[%s1781_s26 + $0x8] sm:$0xff] %v743_v41  ;;  %v634_v51 = vadd.f32 %v1683_v31, %v612_v43  ;;  %v710_v24 = vmul.f32 %v1613_v47, %v1607_v38 }
 0x1be   : > { %v697_v63 = vadd.f32 %v689_v12, %v675_v23  ;;  %v738_v53 = vadd.f32 %v730_v25, %v717_v35  ;;  %v668_v2 = vmul.f32 %v1634_v62, %v1674_v27  ;;  %v731_v18 = vmul.f32 %v1609_v45, %v1674_v27  ;;  %v1903_v27 = vld [vmem:[#allocation17_spill] sm:$0xff] }
 0x1bf   : > { %v736_v42 = vadd.f32 %v728_v48, %v715_v3  ;;  %v655_v52 = vadd.f32 %v647_v44, %v634_v51  ;;  %v690_v31 = vmul.f32 %v1611_v46, %v1733_v30  ;;  %v711_v62 = vmul.f32 %v1613_v47, %v1699_v56 }
 0x1c0   : > { %v718_v10 = vadd.f32 %v710_v24, %v697_v63  ;;  %v746_v57 = vmax.f32 %v738_v53, 0.0  ;;  %v732_v26 = vmul.f32 %v1609_v45, %v1903_v27 }
 0x1c1   : > { %v744_v21 = vmax.f32 %v736_v42, 0.0  ;;  %v676_v38 = vadd.f32 %v668_v2, %v655_v52 }
 0x1c2   : > { %v739_v8 = vadd.f32 %v731_v18, %v718_v10  ;;  %754 = vst [vmem:[%s1781_s26 + $0x20] sm:$0xff] %v746_v57 }
 0x1c3   : > { %752 = vst [vmem:[%s1781_s26 + $0x10] sm:$0xff] %v744_v21  ;;  %v698_v28 = vadd.f32 %v690_v31, %v676_v38 }
 0x1c4   : > { %v747_v5 = vmax.f32 %v739_v8, 0.0 }
 0x1c5   : > { %v719_v54 = vadd.f32 %v711_v62, %v698_v28 }
 0x1c6   : > { %755 = vst [vmem:[%s1781_s26 + $0x28] sm:$0xff] %v747_v5 }
 0x1c7   : > { %v740_v46 = vadd.f32 %v732_v26, %v719_v54 }
 0x1c9   : > { %v748_v47 = vmax.f32 %v740_v46, 0.0 }
 0x1cb   : > { %756 = vst [vmem:[%s1781_s26 + $0x30] sm:$0xff] %v748_v47 }
 0x1cc   : > { %1241 = shalt.err (!%p1238_p13)
}
 0x1cd   : > { %s1242_s12 = scalar_lea.hbm %s1831_s28, 1024  ;;  %s1246_s15 = scalar_lea.hbm %s1883_s5, 2048 }
 0x1ce   : > { %p1243_p9 = scmp.ne.s32.totalorder %s1831_s28, %s1242_s12  ;;  %p1247_p6 = scmp.lt.u32.totalorder %s1831_s28, %s1883_s5 }
 0x1cf   : > { %p1248_p4 = scmp.lt.u32.totalorder %s1246_s15, %s1242_s12  ;;  %p1250_p3 = scmp.lt.u32.totalorder %s1242_s12, %s1831_s28 }
 0x1d0   : > { %p1244_p0 = pnand %p1243_p9, %p1510_p10 }
 0x1d1   : > { %p1249_p8 = por %p1248_p4, %p1247_p6 }
 0x1d2   : > { %p1245_p11 = pneg %p1244_p0 }
 0x1d3   : > { %p1251_p5 = por %p1250_p3, %p1249_p8 }
 0x1d5   : > { %p1252_p7 = pnand %p1251_p5, %p1245_p11 }
 0x1d7   : > { %1255 = shalt.err (!%p1252_p7)
}
 0x1d8   : > { %s1313_s23 = smov 128   ;;  %s1314_s16 = smov 8  }
 0x1d9   : > { %1000 = dma.vmem_to_hbm [thread:$0]  (%p1510_p10), %s1833_s27, 1024, %s1831_s28, %s759_s17, %s1313_s23, %s1313_s23, %s1314_s16  }
 0x1da PF: > { %s787_s6 = sand.u32 1, %s1290_s18   ;;  %p1904_p12 = scmp.ne.s32.totalorder %s1889_s25, 0 }
 0x1db   : > { %p1905_p1 = scmp.ge.s32.totalorder %s1302_s21, 2  ;;  %s788_s11 = scalar_lea.sflag [#allocation5], %s787_s6 }
 0x1dd   : > { %p1020_p2 = pnand %p1905_p1, %p1904_p12 }
 0x1df   : > { %1285 = dma.done.wait (!%p1020_p2), %s788_s11, 1024  }
 0x1e0   : > { %1287 = vsyncadd (!%p1020_p2), %s788_s11, 4294966272  ;;  %p20_p13 = scmp.ge.s32.totalorder %s1500_s14, 4   ;;  %s1906_s18 = smov %s1294_s19 }
 0x1e1   : > { %s1907_s19 = smov %s1298_s20  ;;  %s1908_s20 = smov %s1516_s10 }
 0x1e2   : > { %s1909_s21 = smov %s1500_s14  ;;  %22 = sbr.rel (!%p20_p13) target bundleno = 7 (0x7), region = 105 }
 0x1e9   :  { %793 = vsyncpa [#allocation4], 1 }
 0x1ea   :  { %795 = vsyncpa [#allocation4 + $0x1], 1 }
 0x1eb   :  { %796 = vsyncpa [#allocation7], 1 }
 0x1ec   :  { %797 = vsyncpa [#allocation10], 1 }
 0x1ed   :  { %798 = vsyncpa [#allocation5], 1 }
 0x1ee   :  { %800 = vsyncpa [#allocation5 + $0x1], 1 }

</bundles_post_ra>
